<compile_context>
chip_gen: v7x
topology: tpu7x:2x2x1
jax: 0.10.0
libtpu: 0.0.40
codegen_flags: <defaults>
</compile_context>

<pallas_src>
import functools

import jax
import jax.numpy as jnp
from jax.experimental import pallas as pl
from jax.experimental.pallas import tpu as pltpu

LANE = 128         # vreg lane width: output feature dims padded to multiples of this
SUBLANE = 8        # batch tiles must be a multiple of the sublane count
TILE_B_MAX = 1024  # keeps VMEM use tiny even on v7x's 64 MiB


def _round_up(n, m):
    return ((n + m - 1) // m) * m


def chatnet_kernel(x_ref,
                   w1_ref, b1_ref,
                   w2_ref, b2_ref,
                   w3_ref, b3_ref,
                   w4_ref, b4_ref,
                   o_ref):
    """Fused l1->relu->l2->relu->l3->relu->l4 on lane-dense 128-padded slabs."""
    cdt = w1_ref.dtype  # MXU compute dtype (bf16); accumulation is f32.
    x = x_ref[...].astype(cdt)
    h = jnp.dot(x, w1_ref[...],
                preferred_element_type=jnp.float32) + b1_ref[...]
    h = jnp.maximum(h, 0.0)
    h = jnp.dot(h.astype(cdt), w2_ref[...],
                preferred_element_type=jnp.float32) + b2_ref[...]
    h = jnp.maximum(h, 0.0)
    h = jnp.dot(h.astype(cdt), w3_ref[...],
                preferred_element_type=jnp.float32) + b3_ref[...]
    h = jnp.maximum(h, 0.0)
    h = jnp.dot(h.astype(cdt), w4_ref[...],
                preferred_element_type=jnp.float32) + b4_ref[...]
    o_ref[...] = h.astype(o_ref.dtype)


def prepare_params(params, compute_dtype=jnp.bfloat16):
    """One-time param prep (hoisted out of the per-call hot path).

    torch-convention (out, in) weights -> transposed (in, out), zero-padded to
    a 128-lane multiple on the OUT axis (and on the IN axis for layers 2-4, so
    they match the previous layer's padded activation width), cast to the MXU
    compute dtype; biases zero-padded to (1, out_p), kept f32.  Zero-padding is
    exact: padded hidden lanes compute relu(0 + 0) = 0 and feed all-zero
    weight rows downstream.
    """
    def prep(w, b, pad_in):
        out_f, in_f = w.shape
        in_p = _round_up(in_f, LANE) if pad_in else in_f
        out_p = _round_up(out_f, LANE)
        wt = jnp.zeros((in_p, out_p), compute_dtype)
        wt = wt.at[:in_f, :out_f].set(w.T.astype(compute_dtype))
        bp = jnp.zeros((1, out_p), jnp.float32)
        bp = bp.at[0, :out_f].set(b.astype(jnp.float32))
        return wt, bp

    # Layer 1 keeps its IN dim unpadded (matches the raw x feature dim);
    # layers 2-4 pad IN to match the 128-padded hidden activations.
    w1, b1 = prep(params["w1"], params["b1"], pad_in=False)
    w2, b2 = prep(params["w2"], params["b2"], pad_in=True)
    w3, b3 = prep(params["w3"], params["b3"], pad_in=True)
    w4, b4 = prep(params["w4"], params["b4"], pad_in=True)
    return {"w1": w1, "b1": b1, "w2": w2, "b2": b2,
            "w3": w3, "b3": b3, "w4": w4, "b4": b4}


@functools.partial(jax.jit, static_argnames=("num_classes", "tile_b_max"))
def chatnet_forward(x, pp, num_classes, tile_b_max=TILE_B_MAX):
    """x: (B, input_size) f32.  pp: output of prepare_params.  -> (B, num_classes) f32."""
    B, in_f = x.shape
    assert pp["w1"].shape[0] == in_f, "param prep / input feature mismatch"
    out_p = pp["w4"].shape[1]

    # Batch tile: multiple of 8 sublanes, capped so double-buffered x/o tiles
    # plus the resident padded weights stay far below 64 MiB VMEM.
    tile_b = min(tile_b_max, _round_up(B, SUBLANE))
    b_p = _round_up(B, tile_b)
    grid = (b_p // tile_b,)

    # Only pad the batch when needed (static decision -> no copy if aligned).
    # The feature dim stays unpadded: 32 == full array dim, which the BlockSpec
    # rules allow, and it avoids an extra HBM pass over x.
    if b_p != B:
        xp = jnp.zeros((b_p, in_f), x.dtype).at[:B, :].set(x)
    else:
        xp = x

    def resident(shape):  # weights/biases: same block every grid step -> stay in VMEM
        return pl.BlockSpec(shape, lambda i: (0, 0))

    out_padded = pl.pallas_call(
        chatnet_kernel,
        out_shape=jax.ShapeDtypeStruct((b_p, out_p), jnp.float32),
        grid=grid,
        in_specs=[
            pl.BlockSpec((tile_b, in_f), lambda i: (i, 0)),
            resident(pp["w1"].shape), resident(pp["b1"].shape),
            resident(pp["w2"].shape), resident(pp["b2"].shape),
            resident(pp["w3"].shape), resident(pp["b3"].shape),
            resident(pp["w4"].shape), resident(pp["b4"].shape),
        ],
        out_specs=pl.BlockSpec((tile_b, out_p), lambda i: (i, 0)),
        compiler_params=pltpu.CompilerParams(
            dimension_semantics=("parallel",)),
    )(xp, pp["w1"], pp["b1"], pp["w2"], pp["b2"],
      pp["w3"], pp["b3"], pp["w4"], pp["b4"])

    # Slice the lane-dense padded slab back to the logical output.
    return out_padded[:B, :num_classes]


def init_params(key, input_size, hidden_size1, hidden_size2, num_classes):
    """Deterministic init mimicking nn.Linear's U(-1/sqrt(fan_in), 1/sqrt(fan_in))."""
    keys = jax.random.split(key, 8)

    def lin(kw, kb, fan_in, fan_out):
        bound = 1.0 / jnp.sqrt(jnp.float32(fan_in))
        w = jax.random.uniform(kw, (fan_out, fan_in), jnp.float32, -bound, bound)
        b = jax.random.uniform(kb, (fan_out,), jnp.float32, -bound, bound)
        return w, b

    w1, b1 = lin(keys[0], keys[1], input_size, hidden_size1)
    w2, b2 = lin(keys[2], keys[3], hidden_size1, hidden_size1)
    w3, b3 = lin(keys[4], keys[5], hidden_size1, hidden_size2)
    w4, b4 = lin(keys[6], keys[7], hidden_size2, num_classes)
    return {"w1": w1, "b1": b1, "w2": w2, "b2": b2,
            "w3": w3, "b3": b3, "w4": w4, "b4": b4}


def reference_forward(x, p):
    h = jnp.maximum(x @ p["w1"].T + p["b1"], 0.0)
    h = jnp.maximum(h @ p["w2"].T + p["b2"], 0.0)
    h = jnp.maximum(h @ p["w3"].T + p["b3"], 0.0)
    return h @ p["w4"].T + p["b4"]


if __name__ == "__main__":
    input_size, hidden_size1, hidden_size2, num_classes = 32, 64, 48, 16

    key = jax.random.PRNGKey(0)
    k_x, k_x2, k_p = jax.random.split(key, 3)
    params = init_params(k_p, input_size, hidden_size1, hidden_size2, num_classes)
    pp = prepare_params(params)  # one-time prep: transpose/pad/cast outside the hot path

    # Case 1: sublane-aligned batch (no batch pad materialized).
    x = jax.random.normal(k_x, (8, input_size), jnp.float32)
    out = jax.block_until_ready(chatnet_forward(x, pp, num_classes=num_classes))
    ref = reference_forward(x, params)
    assert out.shape == (8, num_classes)
    # bf16 MXU operands (f32 accumulation) -> tolerance loosened vs pure-f32 path.
    assert jnp.allclose(out, ref, atol=5e-2, rtol=5e-2), "mismatch vs JAX reference (B=8)"

    # Case 2: ragged batch exercises the batch-padding path.
    x2 = jax.random.normal(k_x2, (5, input_size), jnp.float32)
    out2 = jax.block_until_ready(chatnet_forward(x2, pp, num_classes=num_classes))
    ref2 = reference_forward(x2, params)
    assert out2.shape == (5, num_classes)
    assert jnp.allclose(out2, ref2, atol=5e-2, rtol=5e-2), "mismatch vs JAX reference (B=5)"

    print("KERNEL_OK")
</pallas_src>

<mosaic_0001>
module attributes {stable_mosaic.version = 11 : i64} {
  func.func @chatnet_kernel(%arg0: i32, %arg1: memref<8x32xf32, #tpu.memory_space<vmem>>, %arg2: memref<32x128xbf16, #tpu.memory_space<vmem>>, %arg3: memref<1x128xf32, #tpu.memory_space<vmem>>, %arg4: memref<128x128xbf16, #tpu.memory_space<vmem>>, %arg5: memref<1x128xf32, #tpu.memory_space<vmem>>, %arg6: memref<128x128xbf16, #tpu.memory_space<vmem>>, %arg7: memref<1x128xf32, #tpu.memory_space<vmem>>, %arg8: memref<128x128xbf16, #tpu.memory_space<vmem>>, %arg9: memref<1x128xf32, #tpu.memory_space<vmem>>, %arg10: memref<8x128xf32, #tpu.memory_space<vmem>>) attributes {dimension_semantics = [#tpu.dimension_semantics<parallel>], iteration_bounds = array<i64: 1>, scalar_prefetch = 0 : i64, scratch_operands = 0 : i64, tpu.core_type = #tpu.core_type<tc>, window_params = [{transform_indices = @transform_0, window_bounds = array<i64: 8, 32>}, {pipeline_mode = #tpu.pipeline_mode<synchronous>, transform_indices = @transform_1, window_bounds = array<i64: 32, 128>}, {pipeline_mode = #tpu.pipeline_mode<synchronous>, transform_indices = @transform_2, window_bounds = array<i64: 1, 128>}, {pipeline_mode = #tpu.pipeline_mode<synchronous>, transform_indices = @transform_3, window_bounds = array<i64: 128, 128>}, {pipeline_mode = #tpu.pipeline_mode<synchronous>, transform_indices = @transform_4, window_bounds = array<i64: 1, 128>}, {pipeline_mode = #tpu.pipeline_mode<synchronous>, transform_indices = @transform_5, window_bounds = array<i64: 128, 128>}, {pipeline_mode = #tpu.pipeline_mode<synchronous>, transform_indices = @transform_6, window_bounds = array<i64: 1, 128>}, {pipeline_mode = #tpu.pipeline_mode<synchronous>, transform_indices = @transform_7, window_bounds = array<i64: 128, 128>}, {pipeline_mode = #tpu.pipeline_mode<synchronous>, transform_indices = @transform_8, window_bounds = array<i64: 1, 128>}, {transform_indices = @transform_9, window_bounds = array<i64: 8, 128>}]} {
    %c0 = arith.constant 0 : index
    %c0_0 = arith.constant 0 : index
    %0 = vector.load %arg1[%c0, %c0_0] : memref<8x32xf32, #tpu.memory_space<vmem>>, vector<8x32xf32>
    %1 = arith.truncf %0 : vector<8x32xf32> to vector<8x32xbf16>
    %c0_1 = arith.constant 0 : index
    %c0_2 = arith.constant 0 : index
    %2 = vector.load %arg2[%c0_1, %c0_2] : memref<32x128xbf16, #tpu.memory_space<vmem>>, vector<32x128xbf16>
    %cst = arith.constant dense<0.000000e+00> : vector<8x128xf32>
    %3 = tpu.matmul %1, %2, %cst {dimension_numbers = #tpu.dot_dimension_numbers<[1], [0], [0], [1], [0, 0, 1, 1], [], []>} : vector<8x32xbf16>, vector<32x128xbf16>, vector<8x128xf32> -> vector<8x128xf32>
    %c0_3 = arith.constant 0 : index
    %c0_4 = arith.constant 0 : index
    %4 = vector.load %arg3[%c0_3, %c0_4] : memref<1x128xf32, #tpu.memory_space<vmem>>, vector<1x128xf32>
    %5 = vector.broadcast %4 : vector<1x128xf32> to vector<8x128xf32>
    %6 = arith.addf %3, %5 : vector<8x128xf32>
    %cst_5 = arith.constant 0.000000e+00 : f32
    %7 = vector.broadcast %cst_5 : f32 to vector<8x128xf32>
    %8 = arith.maximumf %6, %7 : vector<8x128xf32>
    %9 = arith.truncf %8 : vector<8x128xf32> to vector<8x128xbf16>
    %c0_6 = arith.constant 0 : index
    %c0_7 = arith.constant 0 : index
    %10 = vector.load %arg4[%c0_6, %c0_7] : memref<128x128xbf16, #tpu.memory_space<vmem>>, vector<128x128xbf16>
    %cst_8 = arith.constant dense<0.000000e+00> : vector<8x128xf32>
    %11 = tpu.matmul %9, %10, %cst_8 {dimension_numbers = #tpu.dot_dimension_numbers<[1], [0], [0], [1], [0, 0, 1, 1], [], []>} : vector<8x128xbf16>, vector<128x128xbf16>, vector<8x128xf32> -> vector<8x128xf32>
    %c0_9 = arith.constant 0 : index
    %c0_10 = arith.constant 0 : index
    %12 = vector.load %arg5[%c0_9, %c0_10] : memref<1x128xf32, #tpu.memory_space<vmem>>, vector<1x128xf32>
    %13 = vector.broadcast %12 : vector<1x128xf32> to vector<8x128xf32>
    %14 = arith.addf %11, %13 : vector<8x128xf32>
    %cst_11 = arith.constant 0.000000e+00 : f32
    %15 = vector.broadcast %cst_11 : f32 to vector<8x128xf32>
    %16 = arith.maximumf %14, %15 : vector<8x128xf32>
    %17 = arith.truncf %16 : vector<8x128xf32> to vector<8x128xbf16>
    %c0_12 = arith.constant 0 : index
    %c0_13 = arith.constant 0 : index
    %18 = vector.load %arg6[%c0_12, %c0_13] : memref<128x128xbf16, #tpu.memory_space<vmem>>, vector<128x128xbf16>
    %cst_14 = arith.constant dense<0.000000e+00> : vector<8x128xf32>
    %19 = tpu.matmul %17, %18, %cst_14 {dimension_numbers = #tpu.dot_dimension_numbers<[1], [0], [0], [1], [0, 0, 1, 1], [], []>} : vector<8x128xbf16>, vector<128x128xbf16>, vector<8x128xf32> -> vector<8x128xf32>
    %c0_15 = arith.constant 0 : index
    %c0_16 = arith.constant 0 : index
    %20 = vector.load %arg7[%c0_15, %c0_16] : memref<1x128xf32, #tpu.memory_space<vmem>>, vector<1x128xf32>
    %21 = vector.broadcast %20 : vector<1x128xf32> to vector<8x128xf32>
    %22 = arith.addf %19, %21 : vector<8x128xf32>
    %cst_17 = arith.constant 0.000000e+00 : f32
    %23 = vector.broadcast %cst_17 : f32 to vector<8x128xf32>
    %24 = arith.maximumf %22, %23 : vector<8x128xf32>
    %25 = arith.truncf %24 : vector<8x128xf32> to vector<8x128xbf16>
    %c0_18 = arith.constant 0 : index
    %c0_19 = arith.constant 0 : index
    %26 = vector.load %arg8[%c0_18, %c0_19] : memref<128x128xbf16, #tpu.memory_space<vmem>>, vector<128x128xbf16>
    %cst_20 = arith.constant dense<0.000000e+00> : vector<8x128xf32>
    %27 = tpu.matmul %25, %26, %cst_20 {dimension_numbers = #tpu.dot_dimension_numbers<[1], [0], [0], [1], [0, 0, 1, 1], [], []>} : vector<8x128xbf16>, vector<128x128xbf16>, vector<8x128xf32> -> vector<8x128xf32>
    %c0_21 = arith.constant 0 : index
    %c0_22 = arith.constant 0 : index
    %28 = vector.load %arg9[%c0_21, %c0_22] : memref<1x128xf32, #tpu.memory_space<vmem>>, vector<1x128xf32>
    %29 = vector.broadcast %28 : vector<1x128xf32> to vector<8x128xf32>
    %30 = arith.addf %27, %29 : vector<8x128xf32>
    %c0_23 = arith.constant 0 : index
    %c0_24 = arith.constant 0 : index
    %31 = vector.load %arg10[%c0_23, %c0_24] : memref<8x128xf32, #tpu.memory_space<vmem>>, vector<8x128xf32>
    tpu.vector_store %arg10[%c0_23, %c0_24], %30 {strides = array<i32>} : memref<8x128xf32, #tpu.memory_space<vmem>>, vector<8x128xf32>,
    return
  }
  func.func @transform_0(%arg0: i32) -> (i32, i32) {
    %c0_i32 = arith.constant 0 : i32
    %c0_i32_0 = arith.constant 0 : i32
    return %arg0, %c0_i32 : i32, i32
  }
  func.func @transform_1(%arg0: i32) -> (i32, i32) {
    %c0_i32 = arith.constant 0 : i32
    %c0_i32_0 = arith.constant 0 : i32
    %c0_i32_1 = arith.constant 0 : i32
    return %c0_i32, %c0_i32_0 : i32, i32
  }
  func.func @transform_2(%arg0: i32) -> (i32, i32) {
    %c0_i32 = arith.constant 0 : i32
    %c0_i32_0 = arith.constant 0 : i32
    %c0_i32_1 = arith.constant 0 : i32
    return %c0_i32, %c0_i32_0 : i32, i32
  }
  func.func @transform_3(%arg0: i32) -> (i32, i32) {
    %c0_i32 = arith.constant 0 : i32
    %c0_i32_0 = arith.constant 0 : i32
    %c0_i32_1 = arith.constant 0 : i32
    return %c0_i32, %c0_i32_0 : i32, i32
  }
  func.func @transform_4(%arg0: i32) -> (i32, i32) {
    %c0_i32 = arith.constant 0 : i32
    %c0_i32_0 = arith.constant 0 : i32
    %c0_i32_1 = arith.constant 0 : i32
    return %c0_i32, %c0_i32_0 : i32, i32
  }
  func.func @transform_5(%arg0: i32) -> (i32, i32) {
    %c0_i32 = arith.constant 0 : i32
    %c0_i32_0 = arith.constant 0 : i32
    %c0_i32_1 = arith.constant 0 : i32
    return %c0_i32, %c0_i32_0 : i32, i32
  }
  func.func @transform_6(%arg0: i32) -> (i32, i32) {
    %c0_i32 = arith.constant 0 : i32
    %c0_i32_0 = arith.constant 0 : i32
    %c0_i32_1 = arith.constant 0 : i32
    return %c0_i32, %c0_i32_0 : i32, i32
  }
  func.func @transform_7(%arg0: i32) -> (i32, i32) {
    %c0_i32 = arith.constant 0 : i32
    %c0_i32_0 = arith.constant 0 : i32
    %c0_i32_1 = arith.constant 0 : i32
    return %c0_i32, %c0_i32_0 : i32, i32
  }
  func.func @transform_8(%arg0: i32) -> (i32, i32) {
    %c0_i32 = arith.constant 0 : i32
    %c0_i32_0 = arith.constant 0 : i32
    %c0_i32_1 = arith.constant 0 : i32
    return %c0_i32, %c0_i32_0 : i32, i32
  }
  func.func @transform_9(%arg0: i32) -> (i32, i32) {
    %c0_i32 = arith.constant 0 : i32
    %c0_i32_0 = arith.constant 0 : i32
    return %arg0, %c0_i32 : i32, i32
  }
}

</mosaic_0001>

<bundles_post_ra>
// kernel: chatnet_forward.1
= control target key start
LH: loop header
LB: loop body
LE: loop exit
PB: predicated region body
PF: predicated region fallthrough
CT: control target
= control target key end

     0   :  { %14 = vsyncpa [#allocation3], 0  ;;  %s1067_s0 = inlined_call_operand.hbm [shape: f32[8,32], index: 0, kind: input, shape index: {}]   ;;  %s1068_s1 = inlined_call_operand.vmem [shape: bf16[32,128], index: 1, kind: input, shape index: {}]   ;;  %s1069_s2 = inlined_call_operand.vmem [shape: f32[1,128], index: 2, kind: input, shape index: {}]   ;;  %s1070_s3 = inlined_call_operand.hbm [shape: bf16[128,128], index: 3, kind: input, shape index: {}]   ;;  %s1071_s4 = inlined_call_operand.vmem [shape: f32[1,128], index: 4, kind: input, shape index: {}]   ;;  %s1072_s5 = inlined_call_operand.hbm [shape: bf16[128,128], index: 5, kind: input, shape index: {}]   ;;  %s1073_s6 = inlined_call_operand.hbm [shape: f32[1,128], index: 6, kind: input, shape index: {}]   ;;  %s1074_s7 = inlined_call_operand.hbm [shape: bf16[128,128], index: 7, kind: input, shape index: {}]   ;;  %s1075_s8 = inlined_call_operand.hbm [shape: f32[1,128], index: 8, kind: input, shape index: {}]   ;;  %s1076_s9 = inlined_call_operand.hbm [shape: f32[8,128], index: 9, kind: output, shape index: {}]  }
   0x1   :  { %15 = vsyncpa [#allocation6], 0 }
   0x2   :  { %16 = vsyncpa [#allocation9], 0 }
   0x3   :  { %17 = vsyncpa [#allocation12], 0 }
   0x4   :  { %18 = vsyncpa [#allocation4], 0  ;;  %s867_s30 = smov [#allocation5]   ;;  %s703_s13 = scalar_lea.hbm %s1070_s3, 1024 }
   0x5   :  { %s38_s10 = sshll.u32 %s867_s30, 4  ;;  %p704_p0 = scmp.ne.s32.totalorder %s1070_s3, %s703_s13  ;;  %s39_s10 = int_to_ptr.vmem [resolvable:$true] %s38_s10 }
   0x6   :  { %p707_p1 = scmp.lt.u32.totalorder %s703_s13, %s1070_s3 }
   0x8   :  { %p709_p2 = pnand %p707_p1, %p704_p0 }
   0xa   :  { %712 = shalt.err (!%p709_p2)
}
   0xb   :  { %s713_s18 = scalar_lea.vmem %s39_s10, 1024  ;;  %p718_p4 = scmp.lt.s32.totalorder %s39_s10, %s39_s10 }
   0xc   :  { %p714_p3 = scmp.ne.s32.totalorder %s39_s10, %s713_s18  ;;  %p719_p5 = scmp.lt.s32.totalorder %s713_s18, %s713_s18 }
   0xe   :  { %p720_p6 = por %p719_p5, %p718_p4 }
  0x10   :  { %p721_p7 = pnand %p720_p6, %p714_p3 }
  0x12   :  { %724 = shalt.err (!%p721_p7)
}
  0x13   :  { %s868_s19 = smov 64   ;;  %s869_s20 = smov 4  }
  0x14   :  { %44 = dma.hbm_to_vmem [thread:$0]  %s1070_s3, 1024, %s39_s10, [#allocation6], %s868_s19, %s868_s19, %s869_s20  }
  0x15   :  { %s870_s23 = smov [#allocation8]   ;;  %s871_s25 = smov [#allocation2]  }
  0x16   :  { %s65_s24 = sshll.u32 %s870_s23, 4  ;;  %s25_s26 = sshll.u32 %s871_s25, 4  ;;  %s66_s24 = int_to_ptr.vmem [resolvable:$true] %s65_s24  ;;  %s26_s26 = int_to_ptr.vmem [resolvable:$true] %s25_s26 }
  0x17   :  { %s725_s29 = scalar_lea.hbm %s1073_s6, 16 }
  0x18   :  { %p726_p8 = scmp.ne.s32.totalorder %s1073_s6, %s725_s29  ;;  %p729_p9 = scmp.lt.u32.totalorder %s725_s29, %s1073_s6 }
  0x1a   :  { %p731_p10 = pnand %p729_p9, %p726_p8 }
  0x1c   :  { %734 = shalt.err (!%p731_p10)
}
  0x1d   :  { %s735_s3 = scalar_lea.vmem %s66_s24, 16  ;;  %s739_s10 = scalar_lea.vmem %s66_s24, 32 }
  0x1e   :  { %p736_p11 = scmp.ne.s32.totalorder %s66_s24, %s735_s3  ;;  %p740_p12 = scmp.lt.s32.totalorder %s66_s24, %s66_s24 }
  0x1f   :  { %p741_p13 = scmp.lt.s32.totalorder %s739_s10, %s735_s3 }
  0x21   :  { %p742_p0 = por %p741_p13, %p740_p12 }
  0x23   :  { %p743_p1 = pnand %p742_p0, %p736_p11 }
  0x25   :  { %746 = shalt.err (!%p743_p1)
}
  0x26   :  { %68 = dma.hbm_to_vmem [thread:$0]  %s1073_s6, 16, %s66_s24, [#allocation9]  }
  0x27   :  { %s747_s18 = scalar_lea.hbm %s1067_s0, 128 }
  0x28   :  { %p748_p2 = scmp.ne.s32.totalorder %s1067_s0, %s747_s18  ;;  %p751_p3 = scmp.lt.u32.totalorder %s747_s18, %s1067_s0 }
  0x2a   :  { %p753_p4 = pnand %p751_p3, %p748_p2 }
  0x2c   :  { %756 = shalt.err (!%p753_p4)
}
  0x2d   :  { %s757_s27 = scalar_lea.vmem %s26_s26, 128  ;;  %p762_p6 = scmp.lt.s32.totalorder %s26_s26, %s26_s26 }
  0x2e   :  { %p758_p5 = scmp.ne.s32.totalorder %s26_s26, %s757_s27  ;;  %p763_p7 = scmp.lt.s32.totalorder %s757_s27, %s757_s27 }
  0x30   :  { %p764_p8 = por %p763_p7, %p762_p6 }
  0x32   :  { %p765_p9 = pnand %p764_p8, %p758_p5 }
  0x34   :  { %768 = shalt.err (!%p765_p9)
}
  0x35   :  { %28 = dma.hbm_to_vmem [thread:$0]  %s1067_s0, 128, %s26_s26, [#allocation3]  }
  0x36   :  { %s872_s28 = smov [#allocation7]   ;;  %s873_s30 = smov [#allocation10]  }
  0x37   :  { %s52_s29 = sshll.u32 %s872_s28, 4  ;;  %s74_s11 = sshll.u32 %s873_s30, 4  ;;  %s53_s29 = int_to_ptr.vmem [resolvable:$true] %s52_s29  ;;  %s75_s11 = int_to_ptr.vmem [resolvable:$true] %s74_s11 }
  0x38   :  { %s769_s3 = scalar_lea.hbm %s1072_s5, 1024 }
  0x39   :  { %p770_p10 = scmp.ne.s32.totalorder %s1072_s5, %s769_s3  ;;  %p773_p11 = scmp.lt.u32.totalorder %s769_s3, %s1072_s5 }
  0x3b   :  { %p775_p12 = pnand %p773_p11, %p770_p10 }
  0x3d   :  { %778 = shalt.err (!%p775_p12)
}
  0x3e   :  { %s779_s0 = scalar_lea.vmem %s53_s29, 1024  ;;  %p784_p0 = scmp.lt.s32.totalorder %s53_s29, %s53_s29 }
  0x3f   :  { %p780_p13 = scmp.ne.s32.totalorder %s53_s29, %s779_s0  ;;  %p785_p1 = scmp.lt.s32.totalorder %s779_s0, %s779_s0 }
  0x41   :  { %p786_p2 = por %p785_p1, %p784_p0 }
  0x43   :  { %p787_p3 = pnand %p786_p2, %p780_p13 }
  0x45   :  { %790 = shalt.err (!%p787_p3)
}
  0x46   :  { %58 = dma.hbm_to_vmem [thread:$0]  %s1072_s5, 1024, %s53_s29, [#allocation6], %s868_s19, %s868_s19, %s869_s20  }
  0x47   :  { %s791_s22 = scalar_lea.hbm %s1074_s7, 1024 }
  0x48   :  { %p792_p4 = scmp.ne.s32.totalorder %s1074_s7, %s791_s22  ;;  %p795_p5 = scmp.lt.u32.totalorder %s791_s22, %s1074_s7 }
  0x4a   :  { %p797_p6 = pnand %p795_p5, %p792_p4 }
  0x4c   :  { %800 = shalt.err (!%p797_p6)
}
  0x4d   :  { %s801_s24 = scalar_lea.vmem %s75_s11, 1024  ;;  %p806_p8 = scmp.lt.s32.totalorder %s75_s11, %s75_s11 }
  0x4e   :  { %p802_p7 = scmp.ne.s32.totalorder %s75_s11, %s801_s24  ;;  %p807_p9 = scmp.lt.s32.totalorder %s801_s24, %s801_s24 }
  0x50   :  { %p808_p10 = por %p807_p9, %p806_p8 }
  0x52   :  { %p809_p11 = pnand %p808_p10, %p802_p7 }
  0x54   :  { %812 = shalt.err (!%p809_p11)
}
  0x55   :  { %80 = dma.hbm_to_vmem [thread:$0]  %s1074_s7, 1024, %s75_s11, [#allocation9], %s868_s19, %s868_s19, %s869_s20  }
  0x56   :  { %s874_s29 = smov [#allocation11]   ;;  %s813_s3 = scalar_lea.hbm %s1075_s8, 16 }
  0x57   :  { %s87_s30 = sshll.u32 %s874_s29, 4  ;;  %p814_p12 = scmp.ne.s32.totalorder %s1075_s8, %s813_s3  ;;  %s88_s30 = int_to_ptr.vmem [resolvable:$true] %s87_s30 }
  0x58   :  { %p817_p13 = scmp.lt.u32.totalorder %s813_s3, %s1075_s8 }
  0x5a   :  { %p819_p0 = pnand %p817_p13, %p814_p12 }
  0x5c   :  { %822 = shalt.err (!%p819_p0)
}
  0x5d   :  { %s823_s0 = scalar_lea.vmem %s88_s30, 16  ;;  %s827_s7 = scalar_lea.vmem %s88_s30, 32 }
  0x5e   :  { %p824_p1 = scmp.ne.s32.totalorder %s88_s30, %s823_s0  ;;  %p828_p2 = scmp.lt.s32.totalorder %s88_s30, %s88_s30 }
  0x5f   :  { %p829_p3 = scmp.lt.s32.totalorder %s827_s7, %s823_s0 }
  0x61   :  { %p830_p4 = por %p829_p3, %p828_p2 }
  0x63   :  { %p831_p5 = pnand %p830_p4, %p824_p1 }
  0x65   :  { %834 = shalt.err (!%p831_p5)
}
  0x66   :  { %90 = dma.hbm_to_vmem [thread:$0]  %s1075_s8, 16, %s88_s30, [#allocation12]  }
  0x67   :  { %857 = dma.done.wait [#allocation3], 128  }
  0x68   :  { %858 = vsyncadd [#allocation3], 4294967168 }
  0x69   :  { %859 = dma.done.wait [#allocation6], 2048  }
  0x6a   :  { %860 = vsyncadd [#allocation6], 4294965248 }
  0x6b   :  { %861 = dma.done.wait [#allocation9], 1040  }
  0x6c   :  { %862 = vsyncadd [#allocation9], 4294966256 }
  0x6d   :  { %863 = dma.done.wait [#allocation12], 16  }
  0x6e   :  { %864 = vsyncadd [#allocation12], 4294967280  ;;  %v875_v0 = vmov 0.0   ;;  %vm876_vm0 = vmmov 0   ;;  %v677_v1 = vld [vmem:[%s1068_s1] sm:$0xff]   ;;  %v678_v2 = vld [vmem:[%s1068_s1 + $0x8] sm:$0xff]  }
  0x6f   :  { %598 = vmatprep.subr.bf16.mxu0 %v875_v0  ;;  %602 = vmatprep.mubr.msk.bf16.mxu0 %vm876_vm0, %v875_v0  ;;  %v110_v3 = vld [vmem:[#allocation2] sm:$0xff]  ;;  %v679_v4 = vld [vmem:[#allocation5] sm:$0xff]   ;;  %v680_v6 = vld [vmem:[#allocation5 + $0x8] sm:$0xff]   ;;  %vm135_vm1 = vcmask 261120  }
  0x70   :  { %606 = vmatprep.subr.bf16.mxu1 %v875_v0  ;;  %622 = vmatprep.mubr.msk.bf16.mxu1 %vm876_vm0, %v875_v0  ;;  %v111_v5 = vpack.c.bf16 %v110_v3, %v110_v3  ;;  %v681_v7 = vld [vmem:[#allocation5 + $0x10] sm:$0xff]   ;;  %v682_v8 = vld [vmem:[#allocation5 + $0x18] sm:$0xff]   ;;  %v683_v9 = vld [vmem:[#allocation5 + $0x20] sm:$0xff]  }
  0x71   :  { %599 = vmatpush3.bf16.msra.mxu0 %v677_v1  ;;  %607 = vmatpush3.bf16.msra.mxu1 %v679_v4  ;;  %v684_v10 = vld [vmem:[#allocation5 + $0x28] sm:$0xff]   ;;  %v685_v11 = vld [vmem:[#allocation5 + $0x30] sm:$0xff]   ;;  %v686_v12 = vld [vmem:[#allocation5 + $0x38] sm:$0xff]  }
  0x72   :  { %600 = vmatprep.subr.bf16.mxu0 %v875_v0  ;;  %608 = vmatprep.subr.bf16.mxu1 %v875_v0  ;;  %v687_v13 = vld [vmem:[#allocation7] sm:$0xff]   ;;  %v688_v14 = vld [vmem:[#allocation7 + $0x8] sm:$0xff]   ;;  %v689_v15 = vld [vmem:[#allocation7 + $0x10] sm:$0xff]  }
  0x73   :  { %v690_v16 = vld [vmem:[#allocation7 + $0x18] sm:$0xff]   ;;  %v691_v17 = vld [vmem:[#allocation7 + $0x20] sm:$0xff]   ;;  %v692_v18 = vld [vmem:[#allocation7 + $0x28] sm:$0xff]  }
  0x74   :  { %v537_v19 = vld [vmem:[%s1069_s2] ss:$0 sm:$0xff]  ;;  %v693_v27 = vld [vmem:[#allocation7 + $0x30] sm:$0xff]   ;;  %v694_v28 = vld [vmem:[#allocation7 + $0x38] sm:$0xff]  }
  0x75   :  { %601 = vmatpush3.bf16.msra.mxu0 %v678_v2  ;;  %609 = vmatpush3.bf16.msra.mxu1 %v680_v6  ;;  %v695_v29 = vld [vmem:[#allocation10] sm:$0xff]   ;;  %v696_v30 = vld [vmem:[#allocation10 + $0x8] sm:$0xff]   ;;  %v697_v31 = vld [vmem:[#allocation10 + $0x10] sm:$0xff]  }
  0x76   :  { %626 = vmatprep.subr.bf16.mxu0 %v875_v0  ;;  %610 = vmatprep.subr.bf16.mxu1 %v875_v0  ;;  %v698_v32 = vld [vmem:[#allocation10 + $0x18] sm:$0xff]   ;;  %v699_v33 = vld [vmem:[#allocation10 + $0x20] sm:$0xff]   ;;  %v700_v34 = vld [vmem:[#allocation10 + $0x28] sm:$0xff]  }
  0x77   :  { %v541_v35 = vld [vmem:[%s1071_s4] ss:$0 sm:$0xff]  ;;  %v701_v43 = vld [vmem:[#allocation10 + $0x30] sm:$0xff]   ;;  %v702_v44 = vld [vmem:[#allocation10 + $0x38] sm:$0xff]   ;;  %s877_s4 = smov [#allocation13]  }
  0x78   :  { %603 = vmatmul.mubr.msk.bf16.vlgmr.msra.gmra.mrb[0].mxu0 %vm135_vm1, %v111_v5  ;;  %v550_v45 = vld [vmem:[#allocation8] ss:$0 sm:$0xff]  ;;  %v559_v53 = vld [vmem:[#allocation11] ss:$0 sm:$0xff]  ;;  %s525_s22 = sshll.u32 %s877_s4, 4  ;;  %s526_s22 = int_to_ptr.vmem [resolvable:$true] %s525_s22 }
  0x79   :  { %642 = vmatprep.mubr.msk.bf16.mxu0 %vm876_vm0, %v875_v0  ;;  %611 = vmatpush3.bf16.msra.mxu1 %v681_v7  ;;  %s835_s23 = scalar_lea.vmem %s526_s22, 128  ;;  %p840_p7 = scmp.lt.s32.totalorder %s526_s22, %s526_s22 }
  0x7a   :  { %612 = vmatprep.subr.bf16.mxu1 %v875_v0  ;;  %627 = vmatpush3.bf16.msra.mxu0 %v687_v13  ;;  %p836_p6 = scmp.ne.s32.totalorder %s526_s22, %s835_s23  ;;  %p841_p8 = scmp.lt.s32.totalorder %s835_s23, %s835_s23 }
  0x7b   :  { %628 = vmatprep.subr.bf16.mxu0 %v875_v0 }
  0x7c   :  { %p842_p9 = por %p841_p8, %p840_p7 }
  0x7d   :  { %613 = vmatpush3.bf16.msra.mxu1 %v682_v8 }
  0x7e   :  { %614 = vmatprep.subr.bf16.mxu1 %v875_v0  ;;  %629 = vmatpush3.bf16.msra.mxu0 %v688_v14  ;;  %p843_p10 = pnand %p842_p9, %p836_p6 }
  0x7f   :  { %630 = vmatprep.subr.bf16.mxu0 %v875_v0 }
  0x81   :  { %615 = vmatpush3.bf16.msra.mxu1 %v683_v9 }
  0x82   :  { %616 = vmatprep.subr.bf16.mxu1 %v875_v0  ;;  %631 = vmatpush3.bf16.msra.mxu0 %v689_v15 }
  0x83   :  { %632 = vmatprep.subr.bf16.mxu0 %v875_v0 }
  0x85   :  { %617 = vmatpush3.bf16.msra.mxu1 %v684_v10 }
  0x86   :  { %618 = vmatprep.subr.bf16.mxu1 %v875_v0  ;;  %633 = vmatpush3.bf16.msra.mxu0 %v690_v16 }
  0x87   :  { %634 = vmatprep.subr.bf16.mxu0 %v875_v0 }
  0x89   :  { %619 = vmatpush3.bf16.msra.mxu1 %v685_v11 }
  0x8a   :  { %620 = vmatprep.subr.bf16.mxu1 %v875_v0  ;;  %635 = vmatpush3.bf16.msra.mxu0 %v691_v17 }
  0x8b   :  { %636 = vmatprep.subr.bf16.mxu0 %v875_v0 }
  0x8d   :  { %621 = vmatpush3.bf16.msra.mxu1 %v686_v12 }
  0x8e   :  { %646 = vmatprep.subr.bf16.mxu1 %v875_v0  ;;  %637 = vmatpush3.bf16.msra.mxu0 %v692_v18 }
  0x8f   :  { %638 = vmatprep.subr.bf16.mxu0 %v875_v0 }
  0x92   :  { %639 = vmatpush3.bf16.msra.mxu0 %v693_v27 }
  0x93   :  { %640 = vmatprep.subr.bf16.mxu0 %v875_v0 }
  0x96   :  { %641 = vmatpush3.bf16.msra.mxu0 %v694_v28 }
 0x14b   :  { %v173_v20 = vpop.f32.mrb[0].mxu0 }
 0x14c   :  { %v174_v21 = vadd.f32 %v537_v19, %v173_v20  ;;  %v604_v22 = vpop.f32.mrb[1].mxu0 }
 0x14d   :  { %v176_v23 = vpop.f32.mrb[2].mxu0 }
 0x14e   :  { %v179_v24 = vmax.f32 %v174_v21, 0.0  ;;  %v605_v25 = vpop.f32.mrb[3].mxu0 }
 0x150   :  { %v180_v26 = vpack.c.bf16 %v179_v24, %v179_v24 }
 0x152   :  { %623 = vmatmul.mubr.bf16.vlgmr.msra.gmra.mrb[0].mxu1 %v180_v26 }
 0x153   :  { %662 = vmatprep.mubr.msk.bf16.mxu1 %vm876_vm0, %v875_v0  ;;  %647 = vmatpush3.bf16.msra.mxu1 %v695_v29 }
 0x154   :  { %648 = vmatprep.subr.bf16.mxu1 %v875_v0 }
 0x157   :  { %649 = vmatpush3.bf16.msra.mxu1 %v696_v30 }
 0x158   :  { %650 = vmatprep.subr.bf16.mxu1 %v875_v0 }
 0x15b   :  { %651 = vmatpush3.bf16.msra.mxu1 %v697_v31 }
 0x15c   :  { %652 = vmatprep.subr.bf16.mxu1 %v875_v0 }
 0x15f   :  { %653 = vmatpush3.bf16.msra.mxu1 %v698_v32 }
 0x160   :  { %654 = vmatprep.subr.bf16.mxu1 %v875_v0 }
 0x163   :  { %655 = vmatpush3.bf16.msra.mxu1 %v699_v33 }
 0x164   :  { %656 = vmatprep.subr.bf16.mxu1 %v875_v0 }
 0x167   :  { %657 = vmatpush3.bf16.msra.mxu1 %v700_v34 }
 0x168   :  { %658 = vmatprep.subr.bf16.mxu1 %v875_v0 }
 0x16b   :  { %659 = vmatpush3.bf16.msra.mxu1 %v701_v43 }
 0x16c   :  { %660 = vmatprep.subr.bf16.mxu1 %v875_v0 }
 0x16f   :  { %661 = vmatpush3.bf16.msra.mxu1 %v702_v44 }
 0x225   :  { %v286_v36 = vpop.f32.mrb[0].mxu1 }
 0x226   :  { %v287_v37 = vadd.f32 %v541_v35, %v286_v36  ;;  %v624_v38 = vpop.f32.mrb[1].mxu1 }
 0x227   :  { %v289_v39 = vpop.f32.mrb[2].mxu1 }
 0x228   :  { %v292_v40 = vmax.f32 %v287_v37, 0.0  ;;  %v625_v41 = vpop.f32.mrb[3].mxu1 }
 0x22a   :  { %v293_v42 = vpack.c.bf16 %v292_v40, %v292_v40 }
 0x22c   :  { %643 = vmatmul.mubr.bf16.vlgmr.msra.gmra.mrb[4].mxu0 %v293_v42 }
 0x2ff   :  { %v399_v46 = vpop.f32.mrb[4].mxu0 }
 0x300   :  { %v400_v47 = vadd.f32 %v550_v45, %v399_v46  ;;  %v644_v48 = vpop.f32.mrb[5].mxu0 }
 0x301   :  { %v402_v49 = vpop.f32.mrb[6].mxu0 }
 0x302   :  { %v405_v50 = vmax.f32 %v400_v47, 0.0  ;;  %v645_v51 = vpop.f32.mrb[7].mxu0 }
 0x304   :  { %v406_v52 = vpack.c.bf16 %v405_v50, %v405_v50 }
 0x306   :  { %663 = vmatmul.mubr.bf16.vlgmr.msra.gmra.mrb[4].mxu1 %v406_v52 }
 0x3d9   :  { %v512_v54 = vpop.f32.mrb[4].mxu1 }
 0x3da   :  { %v513_v55 = vadd.f32 %v559_v53, %v512_v54  ;;  %v664_v56 = vpop.f32.mrb[5].mxu1 }
 0x3db   :  { %v515_v57 = vpop.f32.mrb[6].mxu1 }
 0x3dc   :  { %518 = vst [vmem:[#allocation13] sm:$0xff] %v513_v55  ;;  %v665_v58 = vpop.f32.mrb[7].mxu1 }
 0x3dd   :  { %846 = shalt.err (!%p843_p10)
}
 0x3de   :  { %s847_s6 = scalar_lea.hbm %s1076_s9, 128 }
 0x3df   :  { %p848_p11 = scmp.ne.s32.totalorder %s1076_s9, %s847_s6  ;;  %p851_p12 = scmp.lt.u32.totalorder %s847_s6, %s1076_s9 }
 0x3e1   :  { %p853_p13 = pnand %p851_p12, %p848_p11 }
 0x3e3   :  { %856 = shalt.err (!%p853_p13)
}
 0x3e4   :  { %528 = dma.vmem_to_hbm [thread:$0]  %s526_s22, 128, %s1076_s9, [#allocation4]  }
 0x3e5   :  { %865 = dma.done.wait [#allocation4], 128  }
 0x3e6   :  { %866 = vsyncadd [#allocation4], 4294967168 }
 0x3e7   :  { %532 = vsyncpa [#allocation3], 1 }
 0x3e8   :  { %533 = vsyncpa [#allocation6], 1 }
 0x3e9   :  { %534 = vsyncpa [#allocation9], 1 }
 0x3ea   :  { %535 = vsyncpa [#allocation12], 1 }
 0x3eb   :  { %536 = vsyncpa [#allocation4], 1 }

</bundles_post_ra>
